<compile_context>
chip_gen: v7x
topology: tpu7x:2x2x1
jax: 0.10.0
libtpu: 0.0.40
codegen_flags: <defaults>
</compile_context>

<pallas_src>
import functools

import jax
import jax.numpy as jnp
import numpy as np
from jax import lax
from jax.experimental import pallas as pl
from jax.experimental.pallas import tpu as pltpu


def _round_up(x: int, m: int) -> int:
    return ((x + m - 1) // m) * m


# --------------------------------------------------------------------------
# Pass 1: per-batch-tile HRV feature extraction
# --------------------------------------------------------------------------
def hrv_feats_kernel(rr_ref, feats_ref, *, n_valid: int):
    rr = rr_ref[...].astype(jnp.float32)              # (TB, Np), zero padded
    TB, Np = rr.shape

    valid = rr > 0.0
    vf = valid.astype(jnp.float32)

    count = jnp.sum(vf, axis=1, keepdims=True)        # (TB, 1)
    has2 = count > 1.0
    safe_count = jnp.maximum(count, 1.0)
    denom_nm1 = jnp.maximum(count - 1.0, 1.0)

    mean_rr = jnp.sum(rr * vf, axis=1, keepdims=True) / safe_count
    dev = (rr - mean_rr) * vf
    sdnn = jnp.sqrt(jnp.sum(dev * dev, axis=1, keepdims=True) / denom_nm1)

    # ---- successive-difference stats via carry-last-valid scan ------------
    # carry_val[j] = value of last valid element at index <= j
    # carry_has[j] = 1.0 if any valid element exists at index <= j
    # Only ceil(log2(n_valid)) steps: valid data lives in the first n_valid
    # lanes of the 128-lane-padded row.
    lane = lax.broadcasted_iota(jnp.int32, (TB, Np), 1)
    carry_val = rr * vf
    carry_has = vf
    s = 1
    while s < n_valid:                                 # static unroll
        r_val = pltpu.roll(carry_val, s, axis=1)
        r_has = jnp.where(lane >= s, pltpu.roll(carry_has, s, axis=1), 0.0)
        keep = carry_has > 0.5
        carry_val = jnp.where(keep, carry_val, r_val)
        carry_has = jnp.where(keep, carry_has, r_has)
        s *= 2

    # previous-valid value per position (last valid at strictly smaller index)
    prev_val = pltpu.roll(carry_val, 1, axis=1)
    prev_has = jnp.where(lane >= 1, pltpu.roll(carry_has, 1, axis=1), 0.0)

    pair = vf * prev_has            # position j closes one torch.diff pair
    d = (rr - prev_val) * pair      # masked successive difference (reused)
    rmssd = jnp.sqrt(jnp.sum(d * d, axis=1, keepdims=True) / denom_nm1)
    nn50 = jnp.sum((jnp.abs(d) > 0.05).astype(jnp.float32), axis=1,
                   keepdims=True)
    pnn50 = nn50 / denom_nm1

    safe_mean = jnp.maximum(mean_rr, 1e-12)
    hr = 60.0 / safe_mean
    cv = sdnn / safe_mean

    # ---- assemble lane-dense (TB, 128) feature slab via one-hot columns ----
    FL = feats_ref.shape[1]
    col = lax.broadcasted_iota(jnp.int32, (1, FL), 1)

    def onehot(k):
        return (col == k).astype(jnp.float32)

    feats = (mean_rr * onehot(0) + sdnn * onehot(1) + rmssd * onehot(2) +
             pnn50 * onehot(3) + hr * onehot(4) + cv * onehot(5))
    feats = jnp.where(has2, feats, 0.0)    # rows with < 2 valid rr -> zeros
    feats_ref[...] = feats.astype(feats_ref.dtype)


# --------------------------------------------------------------------------
# Pass 2: full-batch column normalization + projection MLP
# --------------------------------------------------------------------------
def _proj(x, w_ref, b_ref, k_used: int, use_mxu: bool):
    """x @ W + b; MXU dot at scale, unrolled VPU broadcast-FMAs when tiny."""
    if use_mxu:
        return jnp.dot(x, w_ref[...],
                       preferred_element_type=jnp.float32) + b_ref[...]
    acc = jnp.zeros((x.shape[0], w_ref.shape[1]), jnp.float32) + b_ref[...]
    for k in range(k_used):                    # static unroll (<= 16 steps)
        acc = acc + x[:, k:k + 1] * w_ref[k:k + 1, :]
    return acc


def hrv_norm_proj_kernel(feats_ref, w1_ref, b1_ref, w2_ref, b2_ref, out_ref,
                         *, batch: int, use_mxu: bool):
    feats = feats_ref[...]                               # (B_pad, 128) f32
    Bp = feats.shape[0]

    # Row mask: column stats over the *actual* batch rows only.
    row = lax.broadcasted_iota(jnp.int32, (Bp, 1), 0)
    rowmask = (row < batch).astype(jnp.float32)

    colmax = jnp.max(feats * rowmask, axis=0, keepdims=True)   # feats >= 0
    colmean = jnp.sum(feats * rowmask, axis=0, keepdims=True) / jnp.float32(batch)
    devc = (feats - colmean) * rowmask
    bdenom = jnp.float32(max(batch - 1, 1))        # guard B == 1 (torch: NaN)
    colstd = jnp.sqrt(jnp.sum(devc * devc, axis=0, keepdims=True) / bdenom)
    normed = (feats - colmean) / (colstd + 1e-8)
    x = jnp.where(colmax > 0.0, normed, feats)

    # Linear(6,16) -> ReLU -> Dropout(identity, eval) -> Linear(16,out)
    h = jnp.maximum(_proj(x, w1_ref, b1_ref, 6, use_mxu), 0.0)
    out = _proj(h, w2_ref, b2_ref, 16, use_mxu)
    out_ref[...] = out.astype(out_ref.dtype)


# --------------------------------------------------------------------------
# Wrapper
# --------------------------------------------------------------------------
def hrv_feature_extractor(rr, w1, b1, w2, b2):
    B, N = rr.shape
    out_dim = w2.shape[1]
    FL = 128                                        # lane-dense feature slab

    # Pad interval axis to a multiple of 128 lanes (rr == 0 means "invalid").
    Np = max(128, _round_up(N, 128))
    rr_p = jnp.pad(rr, ((0, 0), (0, Np - N))) if Np != N else rr

    # Batch-tile selection against a conservative VMEM budget (safe on v7x's
    # 64 MiB physical VMEM and v5e's 16 MiB default scoped limit).
    budget = 40 << 20
    per_row = Np * 4 * 16      # rr (double-buffered) + scan/stat temporaries
    TB = 8
    for cand in (512, 256, 128, 64, 32, 16, 8):
        if cand * per_row <= budget:
            TB = cand
            break
    TB = min(TB, _round_up(B, 8))          # don't pad tiny batches to a huge tile
    B_pad = _round_up(B, TB)
    if B_pad != B:
        rr_p = jnp.pad(rr_p, ((0, B_pad - B), (0, 0)))

    vmem_limit = int(min(max(TB * per_row + (8 << 20), 32 << 20), 64 << 20))

    feats = pl.pallas_call(
        functools.partial(hrv_feats_kernel, n_valid=N),
        out_shape=jax.ShapeDtypeStruct((B_pad, FL), jnp.float32),
        grid=(B_pad // TB,),
        in_specs=[pl.BlockSpec((TB, Np), lambda i: (i, 0))],
        out_specs=pl.BlockSpec((TB, FL), lambda i: (i, 0)),
        compiler_params=pltpu.CompilerParams(
            dimension_semantics=("parallel",),
            vmem_limit_bytes=vmem_limit),
    )(rr_p)

    # Zero-pad the MLP weights to lane-dense shapes.
    w1p = jnp.zeros((FL, 16), jnp.float32).at[:6, :].set(w1.astype(jnp.float32))
    b1p = jnp.asarray(b1, jnp.float32).reshape(1, 16)
    OP = max(128, _round_up(out_dim, 128))
    w2p = jnp.zeros((16, OP), jnp.float32).at[:, :out_dim].set(
        w2.astype(jnp.float32))
    b2p = jnp.zeros((1, OP), jnp.float32).at[:, :out_dim].set(
        jnp.asarray(b2, jnp.float32).reshape(1, -1))

    use_mxu = B_pad >= 128
    vspec = lambda: pl.BlockSpec(memory_space=pltpu.MemorySpace.VMEM)
    out = pl.pallas_call(
        functools.partial(hrv_norm_proj_kernel, batch=B, use_mxu=use_mxu),
        out_shape=jax.ShapeDtypeStruct((B_pad, OP), jnp.float32),
        in_specs=[vspec() for _ in range(5)],
        out_specs=vspec(),
    )(feats, w1p, b1p, w2p, b2p)

    return out[:B, :out_dim]


# --------------------------------------------------------------------------
# NumPy reference (mirrors the PyTorch module)
# --------------------------------------------------------------------------
def reference_numpy(rr, w1, b1, w2, b2):
    rr = np.asarray(rr, np.float32)
    B = rr.shape[0]
    feats = np.zeros((B, 6), np.float32)
    for i in range(B):
        v = rr[i][rr[i] > 0]
        if len(v) > 1:
            mean_rr = v.mean()
            sdnn = v.std(ddof=1)
            d = np.diff(v)
            rmssd = np.sqrt(np.mean(d ** 2))
            nn50 = np.sum(np.abs(d) > 0.05)
            pnn50 = nn50 / (len(v) - 1)
            feats[i] = [mean_rr, sdnn, rmssd, pnn50, 60.0 / mean_rr,
                        sdnn / mean_rr]
    for j in range(6):
        if feats[:, j].max() > 0:
            feats[:, j] = (feats[:, j] - feats[:, j].mean()) / \
                          (feats[:, j].std(ddof=1) + 1e-8)
    h = np.maximum(feats @ np.asarray(w1) + np.asarray(b1), 0.0)
    return h @ np.asarray(w2) + np.asarray(b2)


if __name__ == "__main__":
    key = jax.random.PRNGKey(0)
    k_rr, k_w1, k_b1, k_w2, k_b2, k_rr2 = jax.random.split(key, 6)

    batch, num_intervals, output_dim = 4, 16, 32

    # RR intervals in seconds (~0.5 - 1.2 s), with some invalid (=0) entries.
    rr = jax.random.uniform(k_rr, (batch, num_intervals), jnp.float32,
                            minval=0.5, maxval=1.2)
    rr = rr.at[0, 3].set(0.0)
    rr = rr.at[2, 5:8].set(0.0)
    rr = rr.at[3, :].set(0.0)
    rr = rr.at[3, 0].set(0.8)       # only one valid interval -> zero features

    # Deterministic synthetic parameters for the projection MLP.
    w1 = jax.random.normal(k_w1, (6, 16), jnp.float32) * 0.3
    b1 = jax.random.normal(k_b1, (1, 16), jnp.float32) * 0.1
    w2 = jax.random.normal(k_w2, (16, output_dim), jnp.float32) * 0.3
    b2 = jax.random.normal(k_b2, (1, output_dim), jnp.float32) * 0.1

    out = jax.block_until_ready(hrv_feature_extractor(rr, w1, b1, w2, b2))
    ref = reference_numpy(rr, w1, b1, w2, b2)
    np.testing.assert_allclose(np.asarray(out), ref, rtol=1e-3, atol=1e-3)

    # Second config: exercises batch padding (20 -> 24 rows) and a longer,
    # non-multiple-of-128 interval axis (40 -> 128 lanes).
    rr2 = jax.random.uniform(k_rr2, (20, 40), jnp.float32,
                             minval=0.5, maxval=1.2)
    rr2 = rr2.at[1, 7:20].set(0.0)
    rr2 = rr2.at[5, :].set(0.0)
    out2 = jax.block_until_ready(hrv_feature_extractor(rr2, w1, b1, w2, b2))
    ref2 = reference_numpy(rr2, w1, b1, w2, b2)
    np.testing.assert_allclose(np.asarray(out2), ref2, rtol=1e-3, atol=1e-3)

    print("KERNEL_OK")
</pallas_src>

<mosaic_0001>
module attributes {stable_mosaic.version = 11 : i64} {
  func.func @hrv_feats_kernel(%arg0: i32, %arg1: memref<8x128xf32, #tpu.memory_space<vmem>>, %arg2: memref<8x128xf32, #tpu.memory_space<vmem>>) attributes {dimension_semantics = [#tpu.dimension_semantics<parallel>], iteration_bounds = array<i64: 1>, scalar_prefetch = 0 : i64, scratch_operands = 0 : i64, tpu.core_type = #tpu.core_type<tc>, window_params = [{transform_indices = @transform_0, window_bounds = array<i64: 8, 128>}, {transform_indices = @transform_1, window_bounds = array<i64: 8, 128>}]} {
    %c0 = arith.constant 0 : index
    %c0_0 = arith.constant 0 : index
    %0 = vector.load %arg1[%c0, %c0_0] : memref<8x128xf32, #tpu.memory_space<vmem>>, vector<8x128xf32>
    %cst = arith.constant 0.000000e+00 : f32
    %1 = vector.broadcast %cst : f32 to vector<8x128xf32>
    %2 = arith.cmpf ogt, %0, %1 : vector<8x128xf32>
    %3 = arith.extui %2 : vector<8x128xi1> to vector<8x128xi32>
    %4 = arith.sitofp %3 : vector<8x128xi32> to vector<8x128xf32>
    %cst_1 = arith.constant dense<0.000000e+00> : vector<8xf32>
    %5 = vector.multi_reduction <add>, %4, %cst_1 [1] : vector<8x128xf32> to vector<8xf32>
    %6 = vector.shape_cast %5 : vector<8xf32> to vector<8x1xf32>
    %cst_2 = arith.constant 1.000000e+00 : f32
    %7 = vector.broadcast %cst_2 : f32 to vector<8x1xf32>
    %8 = arith.cmpf ogt, %6, %7 : vector<8x1xf32>
    %cst_3 = arith.constant 1.000000e+00 : f32
    %9 = vector.broadcast %cst_3 : f32 to vector<8x1xf32>
    %10 = arith.maximumf %6, %9 : vector<8x1xf32>
    %cst_4 = arith.constant 1.000000e+00 : f32
    %11 = vector.broadcast %cst_4 : f32 to vector<8x1xf32>
    %12 = arith.subf %6, %11 : vector<8x1xf32>
    %cst_5 = arith.constant 1.000000e+00 : f32
    %13 = vector.broadcast %cst_5 : f32 to vector<8x1xf32>
    %14 = arith.maximumf %12, %13 : vector<8x1xf32>
    %15 = arith.mulf %0, %4 : vector<8x128xf32>
    %cst_6 = arith.constant dense<0.000000e+00> : vector<8xf32>
    %16 = vector.multi_reduction <add>, %15, %cst_6 [1] : vector<8x128xf32> to vector<8xf32>
    %17 = vector.shape_cast %16 : vector<8xf32> to vector<8x1xf32>
    %18 = arith.divf %17, %10 : vector<8x1xf32>
    %19 = vector.broadcast %18 : vector<8x1xf32> to vector<8x128xf32>
    %20 = arith.subf %0, %19 : vector<8x128xf32>
    %21 = arith.mulf %20, %4 : vector<8x128xf32>
    %22 = arith.mulf %21, %21 : vector<8x128xf32>
    %cst_7 = arith.constant dense<0.000000e+00> : vector<8xf32>
    %23 = vector.multi_reduction <add>, %22, %cst_7 [1] : vector<8x128xf32> to vector<8xf32>
    %24 = vector.shape_cast %23 : vector<8xf32> to vector<8x1xf32>
    %25 = arith.divf %24, %14 : vector<8x1xf32>
    %26 = math.sqrt %25 : vector<8x1xf32>
    %27 = tpu.iota {dimensions = array<i32: 1>} : vector<8x128xi32>
    %28 = arith.mulf %0, %4 : vector<8x128xf32>
    %c1_i32 = arith.constant 1 : i32
    %29 = tpu.dynamic_rotate %28 by %c1_i32 dim 1 : vector<8x128xf32>, i32 -> vector<8x128xf32>
    %c1_i32_8 = arith.constant 1 : i32
    %30 = vector.broadcast %c1_i32_8 : i32 to vector<8x128xi32>
    %31 = arith.cmpi sge, %27, %30 : vector<8x128xi32>
    %c1_i32_9 = arith.constant 1 : i32
    %32 = tpu.dynamic_rotate %4 by %c1_i32_9 dim 1 : vector<8x128xf32>, i32 -> vector<8x128xf32>
    %cst_10 = arith.constant 0.000000e+00 : f32
    %33 = vector.broadcast %cst_10 : f32 to vector<8x128xf32>
    %34 = arith.select %31, %32, %33 : vector<8x128xi1>, vector<8x128xf32>
    %cst_11 = arith.constant 5.000000e-01 : f32
    %35 = vector.broadcast %cst_11 : f32 to vector<8x128xf32>
    %36 = arith.cmpf ogt, %4, %35 : vector<8x128xf32>
    %37 = arith.select %36, %28, %29 : vector<8x128xi1>, vector<8x128xf32>
    %38 = arith.select %36, %4, %34 : vector<8x128xi1>, vector<8x128xf32>
    %c2_i32 = arith.constant 2 : i32
    %39 = tpu.dynamic_rotate %37 by %c2_i32 dim 1 : vector<8x128xf32>, i32 -> vector<8x128xf32>
    %c2_i32_12 = arith.constant 2 : i32
    %40 = vector.broadcast %c2_i32_12 : i32 to vector<8x128xi32>
    %41 = arith.cmpi sge, %27, %40 : vector<8x128xi32>
    %c2_i32_13 = arith.constant 2 : i32
    %42 = tpu.dynamic_rotate %38 by %c2_i32_13 dim 1 : vector<8x128xf32>, i32 -> vector<8x128xf32>
    %cst_14 = arith.constant 0.000000e+00 : f32
    %43 = vector.broadcast %cst_14 : f32 to vector<8x128xf32>
    %44 = arith.select %41, %42, %43 : vector<8x128xi1>, vector<8x128xf32>
    %cst_15 = arith.constant 5.000000e-01 : f32
    %45 = vector.broadcast %cst_15 : f32 to vector<8x128xf32>
    %46 = arith.cmpf ogt, %38, %45 : vector<8x128xf32>
    %47 = arith.select %46, %37, %39 : vector<8x128xi1>, vector<8x128xf32>
    %48 = arith.select %46, %38, %44 : vector<8x128xi1>, vector<8x128xf32>
    %c4_i32 = arith.constant 4 : i32
    %49 = tpu.dynamic_rotate %47 by %c4_i32 dim 1 : vector<8x128xf32>, i32 -> vector<8x128xf32>
    %c4_i32_16 = arith.constant 4 : i32
    %50 = vector.broadcast %c4_i32_16 : i32 to vector<8x128xi32>
    %51 = arith.cmpi sge, %27, %50 : vector<8x128xi32>
    %c4_i32_17 = arith.constant 4 : i32
    %52 = tpu.dynamic_rotate %48 by %c4_i32_17 dim 1 : vector<8x128xf32>, i32 -> vector<8x128xf32>
    %cst_18 = arith.constant 0.000000e+00 : f32
    %53 = vector.broadcast %cst_18 : f32 to vector<8x128xf32>
    %54 = arith.select %51, %52, %53 : vector<8x128xi1>, vector<8x128xf32>
    %cst_19 = arith.constant 5.000000e-01 : f32
    %55 = vector.broadcast %cst_19 : f32 to vector<8x128xf32>
    %56 = arith.cmpf ogt, %48, %55 : vector<8x128xf32>
    %57 = arith.select %56, %47, %49 : vector<8x128xi1>, vector<8x128xf32>
    %58 = arith.select %56, %48, %54 : vector<8x128xi1>, vector<8x128xf32>
    %c8_i32 = arith.constant 8 : i32
    %59 = tpu.dynamic_rotate %57 by %c8_i32 dim 1 : vector<8x128xf32>, i32 -> vector<8x128xf32>
    %c8_i32_20 = arith.constant 8 : i32
    %60 = vector.broadcast %c8_i32_20 : i32 to vector<8x128xi32>
    %61 = arith.cmpi sge, %27, %60 : vector<8x128xi32>
    %c8_i32_21 = arith.constant 8 : i32
    %62 = tpu.dynamic_rotate %58 by %c8_i32_21 dim 1 : vector<8x128xf32>, i32 -> vector<8x128xf32>
    %cst_22 = arith.constant 0.000000e+00 : f32
    %63 = vector.broadcast %cst_22 : f32 to vector<8x128xf32>
    %64 = arith.select %61, %62, %63 : vector<8x128xi1>, vector<8x128xf32>
    %cst_23 = arith.constant 5.000000e-01 : f32
    %65 = vector.broadcast %cst_23 : f32 to vector<8x128xf32>
    %66 = arith.cmpf ogt, %58, %65 : vector<8x128xf32>
    %67 = arith.select %66, %57, %59 : vector<8x128xi1>, vector<8x128xf32>
    %68 = arith.select %66, %58, %64 : vector<8x128xi1>, vector<8x128xf32>
    %c1_i32_24 = arith.constant 1 : i32
    %69 = tpu.dynamic_rotate %67 by %c1_i32_24 dim 1 : vector<8x128xf32>, i32 -> vector<8x128xf32>
    %c1_i32_25 = arith.constant 1 : i32
    %70 = vector.broadcast %c1_i32_25 : i32 to vector<8x128xi32>
    %71 = arith.cmpi sge, %27, %70 : vector<8x128xi32>
    %c1_i32_26 = arith.constant 1 : i32
    %72 = tpu.dynamic_rotate %68 by %c1_i32_26 dim 1 : vector<8x128xf32>, i32 -> vector<8x128xf32>
    %cst_27 = arith.constant 0.000000e+00 : f32
    %73 = vector.broadcast %cst_27 : f32 to vector<8x128xf32>
    %74 = arith.select %71, %72, %73 : vector<8x128xi1>, vector<8x128xf32>
    %75 = arith.mulf %4, %74 : vector<8x128xf32>
    %76 = arith.subf %0, %69 : vector<8x128xf32>
    %77 = arith.mulf %76, %75 : vector<8x128xf32>
    %78 = arith.mulf %77, %77 : vector<8x128xf32>
    %cst_28 = arith.constant dense<0.000000e+00> : vector<8xf32>
    %79 = vector.multi_reduction <add>, %78, %cst_28 [1] : vector<8x128xf32> to vector<8xf32>
    %80 = vector.shape_cast %79 : vector<8xf32> to vector<8x1xf32>
    %81 = arith.divf %80, %14 : vector<8x1xf32>
    %82 = math.sqrt %81 : vector<8x1xf32>
    %83 = math.absf %77 : vector<8x128xf32>
    %cst_29 = arith.constant 5.000000e-02 : f32
    %84 = vector.broadcast %cst_29 : f32 to vector<8x128xf32>
    %85 = arith.cmpf ogt, %83, %84 : vector<8x128xf32>
    %86 = arith.extui %85 : vector<8x128xi1> to vector<8x128xi32>
    %87 = arith.sitofp %86 : vector<8x128xi32> to vector<8x128xf32>
    %cst_30 = arith.constant dense<0.000000e+00> : vector<8xf32>
    %88 = vector.multi_reduction <add>, %87, %cst_30 [1] : vector<8x128xf32> to vector<8xf32>
    %89 = vector.shape_cast %88 : vector<8xf32> to vector<8x1xf32>
    %90 = arith.divf %89, %14 : vector<8x1xf32>
    %cst_31 = arith.constant 9.99999996E-13 : f32
    %91 = vector.broadcast %cst_31 : f32 to vector<8x1xf32>
    %92 = arith.maximumf %18, %91 : vector<8x1xf32>
    %cst_32 = arith.constant 6.000000e+01 : f32
    %93 = vector.broadcast %cst_32 : f32 to vector<8x1xf32>
    %94 = arith.divf %93, %92 : vector<8x1xf32>
    %95 = arith.divf %26, %92 : vector<8x1xf32>
    %96 = tpu.iota {dimensions = array<i32: 1>} : vector<1x128xi32>
    %c0_i32 = arith.constant 0 : i32
    %97 = vector.broadcast %c0_i32 : i32 to vector<1x128xi32>
    %98 = arith.cmpi eq, %96, %97 : vector<1x128xi32>
    %99 = arith.extui %98 : vector<1x128xi1> to vector<1x128xi32>
    %100 = arith.sitofp %99 : vector<1x128xi32> to vector<1x128xf32>
    %101 = vector.broadcast %18 : vector<8x1xf32> to vector<8x128xf32>
    %102 = vector.broadcast %100 : vector<1x128xf32> to vector<8x128xf32>
    %103 = arith.mulf %101, %102 : vector<8x128xf32>
    %c1_i32_33 = arith.constant 1 : i32
    %104 = vector.broadcast %c1_i32_33 : i32 to vector<1x128xi32>
    %105 = arith.cmpi eq, %96, %104 : vector<1x128xi32>
    %106 = arith.extui %105 : vector<1x128xi1> to vector<1x128xi32>
    %107 = arith.sitofp %106 : vector<1x128xi32> to vector<1x128xf32>
    %108 = vector.broadcast %26 : vector<8x1xf32> to vector<8x128xf32>
    %109 = vector.broadcast %107 : vector<1x128xf32> to vector<8x128xf32>
    %110 = arith.mulf %108, %109 : vector<8x128xf32>
    %111 = arith.addf %103, %110 : vector<8x128xf32>
    %c2_i32_34 = arith.constant 2 : i32
    %112 = vector.broadcast %c2_i32_34 : i32 to vector<1x128xi32>
    %113 = arith.cmpi eq, %96, %112 : vector<1x128xi32>
    %114 = arith.extui %113 : vector<1x128xi1> to vector<1x128xi32>
    %115 = arith.sitofp %114 : vector<1x128xi32> to vector<1x128xf32>
    %116 = vector.broadcast %82 : vector<8x1xf32> to vector<8x128xf32>
    %117 = vector.broadcast %115 : vector<1x128xf32> to vector<8x128xf32>
    %118 = arith.mulf %116, %117 : vector<8x128xf32>
    %119 = arith.addf %111, %118 : vector<8x128xf32>
    %c3_i32 = arith.constant 3 : i32
    %120 = vector.broadcast %c3_i32 : i32 to vector<1x128xi32>
    %121 = arith.cmpi eq, %96, %120 : vector<1x128xi32>
    %122 = arith.extui %121 : vector<1x128xi1> to vector<1x128xi32>
    %123 = arith.sitofp %122 : vector<1x128xi32> to vector<1x128xf32>
    %124 = vector.broadcast %90 : vector<8x1xf32> to vector<8x128xf32>
    %125 = vector.broadcast %123 : vector<1x128xf32> to vector<8x128xf32>
    %126 = arith.mulf %124, %125 : vector<8x128xf32>
    %127 = arith.addf %119, %126 : vector<8x128xf32>
    %c4_i32_35 = arith.constant 4 : i32
    %128 = vector.broadcast %c4_i32_35 : i32 to vector<1x128xi32>
    %129 = arith.cmpi eq, %96, %128 : vector<1x128xi32>
    %130 = arith.extui %129 : vector<1x128xi1> to vector<1x128xi32>
    %131 = arith.sitofp %130 : vector<1x128xi32> to vector<1x128xf32>
    %132 = vector.broadcast %94 : vector<8x1xf32> to vector<8x128xf32>
    %133 = vector.broadcast %131 : vector<1x128xf32> to vector<8x128xf32>
    %134 = arith.mulf %132, %133 : vector<8x128xf32>
    %135 = arith.addf %127, %134 : vector<8x128xf32>
    %c5_i32 = arith.constant 5 : i32
    %136 = vector.broadcast %c5_i32 : i32 to vector<1x128xi32>
    %137 = arith.cmpi eq, %96, %136 : vector<1x128xi32>
    %138 = arith.extui %137 : vector<1x128xi1> to vector<1x128xi32>
    %139 = arith.sitofp %138 : vector<1x128xi32> to vector<1x128xf32>
    %140 = vector.broadcast %95 : vector<8x1xf32> to vector<8x128xf32>
    %141 = vector.broadcast %139 : vector<1x128xf32> to vector<8x128xf32>
    %142 = arith.mulf %140, %141 : vector<8x128xf32>
    %143 = arith.addf %135, %142 : vector<8x128xf32>
    %cst_36 = arith.constant 0.000000e+00 : f32
    %144 = vector.shape_cast %8 : vector<8x1xi1> to vector<8x1xi1>
    %145 = vector.broadcast %144 : vector<8x1xi1> to vector<8x128xi1>
    %146 = vector.broadcast %cst_36 : f32 to vector<8x128xf32>
    %147 = arith.select %145, %143, %146 : vector<8x128xi1>, vector<8x128xf32>
    %c0_37 = arith.constant 0 : index
    %c0_38 = arith.constant 0 : index
    %148 = vector.load %arg2[%c0_37, %c0_38] : memref<8x128xf32, #tpu.memory_space<vmem>>, vector<8x128xf32>
    tpu.vector_store %arg2[%c0_37, %c0_38], %147 {strides = array<i32>} : memref<8x128xf32, #tpu.memory_space<vmem>>, vector<8x128xf32>,
    return
  }
  func.func @transform_0(%arg0: i32) -> (i32, i32) {
    %c0_i32 = arith.constant 0 : i32
    %c0_i32_0 = arith.constant 0 : i32
    return %arg0, %c0_i32 : i32, i32
  }
  func.func @transform_1(%arg0: i32) -> (i32, i32) {
    %c0_i32 = arith.constant 0 : i32
    %c0_i32_0 = arith.constant 0 : i32
    return %arg0, %c0_i32 : i32, i32
  }
}

</mosaic_0001>

<bundles_post_ra>
// kernel: tpu_custom_call.1
= control target key start
LH: loop header
LB: loop body
LE: loop exit
PB: predicated region body
PF: predicated region fallthrough
CT: control target
= control target key end

     0   :  { %6 = vsyncpa [#allocation3], 0  ;;  %s320_s0 = inlined_call_operand.hbm [shape: f32[8,128], index: 0, kind: input, shape index: {}]   ;;  %s321_s1 = inlined_call_operand.hbm [shape: f32[8,128], index: 1, kind: output, shape index: {}]  }
   0x1   :  { %7 = vsyncpa [#allocation4], 0  ;;  %s240_s6 = smov [#allocation2]   ;;  %s192_s10 = scalar_lea.hbm %s320_s0, 128 }
   0x2   :  { %s14_s7 = sshll.u32 %s240_s6, 4  ;;  %p193_p0 = scmp.ne.s32.totalorder %s320_s0, %s192_s10  ;;  %s15_s7 = int_to_ptr.vmem [resolvable:$true] %s14_s7 }
   0x3   :  { %p196_p1 = scmp.lt.u32.totalorder %s192_s10, %s320_s0 }
   0x5   :  { %p198_p2 = pnand %p196_p1, %p193_p0 }
   0x7   :  { %201 = shalt.err (!%p198_p2)
}
   0x8   :  { %s202_s15 = scalar_lea.vmem %s15_s7, 128  ;;  %p207_p4 = scmp.lt.s32.totalorder %s15_s7, %s15_s7 }
   0x9   :  { %p203_p3 = scmp.ne.s32.totalorder %s15_s7, %s202_s15  ;;  %p208_p5 = scmp.lt.s32.totalorder %s202_s15, %s202_s15 }
   0xb   :  { %p209_p6 = por %p208_p5, %p207_p4 }
   0xd   :  { %p210_p7 = pnand %p209_p6, %p203_p3 }
   0xf   :  { %213 = shalt.err (!%p210_p7)
}
  0x10   :  { %17 = dma.hbm_to_vmem [thread:$0]  %s320_s0, 128, %s15_s7, [#allocation3]  }
  0x11   :  { %236 = dma.done.wait [#allocation3], 128  }
  0x12   :  { %237 = vsyncadd [#allocation3], 4294967168  ;;  %v269_v0 = vld [vmem:[#allocation2] sm:$0xff]  ;;  %v241_v1 = vmov 0.0   ;;  %s242_s18 = smov 1   ;;  %v50_v4 = vlaneseq  ;;  %s243_s0 = smov 2  }
  0x13   :  { %vm22_vm0 = vcmp.gt.f32.partialorder %v269_v0, 0.0  ;;  %s244_s19 = smov 4   ;;  %s245_s20 = smov 8  }
  0x14   :  { %v166_v2 = vsel %vm22_vm0, 1.0, %v241_v1  ;;  %v276_v5 = vand.u32 127, %v50_v4  ;;  %s246_s21 = smov [#allocation5]  }
  0x15   :  { %55 = vrot.lane.b32.xlu0 %v166_v2, %s242_s18  ;;  %v31_v3 = vmul.f32 %v166_v2, %v269_v0  ;;  %vm58_vm2 = vcmp.gt.f32.partialorder %v166_v2, 0.5  ;;  %s157_s22 = sshll.u32 %s246_s21, 4  ;;  %s158_s22 = int_to_ptr.vmem [resolvable:$true] %s157_s22 }
  0x16   :  { %vm54_vm1 = vcmp.ge.s32.totalorder %v276_v5, 1  ;;  %vm63_vm3 = vcmp.ge.s32.totalorder %v276_v5, 2  ;;  %vm72_vm5 = vcmp.ge.s32.totalorder %v276_v5, 4  ;;  %vm81_vm7 = vcmp.ge.s32.totalorder %v276_v5, 8  ;;  %s214_s23 = scalar_lea.vmem %s158_s22, 128  ;;  %p219_p9 = scmp.lt.s32.totalorder %s158_s22, %s158_s22 }
  0x17   :  { %vm118_vm10 = vcmp.eq.s32.totalorder %v276_v5, 0  ;;  %vm122_vm11 = vcmp.eq.s32.totalorder %v276_v5, 1  ;;  %vm127_vm14 = vcmp.eq.s32.totalorder %v276_v5, 2  ;;  %vm132_vm15 = vcmp.eq.s32.totalorder %v276_v5, 3  ;;  %p215_p8 = scmp.ne.s32.totalorder %s158_s22, %s214_s23  ;;  %p220_p10 = scmp.lt.s32.totalorder %s214_s23, %s214_s23 }
  0x18   :  { %v169_v51 = vsel %vm118_vm10, 1.0, %v241_v1  ;;  %v170_v53 = vsel %vm122_vm11, 1.0, %v241_v1 }
  0x19   :  { %52 = vrot.lane.b32.xlu0 %v31_v3, %s242_s18  ;;  %p221_p11 = por %p220_p10, %p219_p9 }
  0x1b   :  { %p222_p12 = pnand %p221_p11, %p215_p8 }
  0x87   :  { %v56_v6 = vpop.permute.xlu0 %55 }
  0x88   :  { %v57_v7 = vsel %vm54_vm1, %v56_v6, 0.0 }
  0x89   :  { %v60_v8 = vsel %vm58_vm2, %v166_v2, %v57_v7 }
  0x8a   :  { %64 = vrot.lane.b32.xlu1 %v60_v8, %s243_s0  ;;  %vm67_vm4 = vcmp.gt.f32.partialorder %v60_v8, 0.5 }
  0x8b   :  { %v53_v9 = vpop.permute.xlu0 %52 }
  0x8c   :  { %v59_v10 = vsel %vm58_vm2, %v31_v3, %v53_v9 }
  0x8e   :  { %61 = vrot.lane.b32.xlu1 %v59_v10, %s243_s0 }
  0xfc   :  { %v65_v11 = vpop.permute.xlu1 %64 }
  0xfd   :  { %v66_v12 = vsel %vm63_vm3, %v65_v11, 0.0  ;;  %vm142_vm3 = vcmp.eq.s32.totalorder %v276_v5, 5 }
  0xfe   :  { %v69_v13 = vsel %vm67_vm4, %v60_v8, %v66_v12  ;;  %v172_v8 = vsel %vm132_vm15, 1.0, %v241_v1 }
  0xff   :  { %73 = vrot.lane.b32.xlu0 %v69_v13, %s244_s19  ;;  %vm76_vm6 = vcmp.gt.f32.partialorder %v69_v13, 0.5 }
 0x100   :  { %v62_v14 = vpop.permute.xlu1 %61 }
 0x101   :  { %v68_v15 = vsel %vm67_vm4, %v59_v10, %v62_v14 }
 0x102   :  { %70 = vrot.lane.b32.xlu1 %v68_v15, %s244_s19 }
 0x171   :  { %v74_v16 = vpop.permute.xlu0 %73 }
 0x172   :  { %v75_v17 = vsel %vm72_vm5, %v74_v16, 0.0 }
 0x173   :  { %v78_v18 = vsel %vm76_vm6, %v69_v13, %v75_v17 }
 0x174   :  { %v71_v19 = vpop.permute.xlu1 %70  ;;  %82 = vrot.lane.b32.xlu0 %v78_v18, %s245_s20  ;;  %vm85_vm8 = vcmp.gt.f32.partialorder %v78_v18, 0.5 }
 0x175   :  { %v77_v20 = vsel %vm76_vm6, %v68_v15, %v71_v19  ;;  %v174_v15 = vsel %vm142_vm3, 1.0, %v241_v1 }
 0x176   :  { %79 = vrot.lane.b32.xlu1 %v77_v20, %s245_s20 }
 0x193   :  { %25 = vadd.xlane.f32.xlu0 %v166_v2 }
 0x19a   :  { %32 = vadd.xlane.f32.xlu1 %v31_v3  ;;  %v171_v3 = vsel %vm127_vm14, 1.0, %v241_v1 }
 0x1e6   :  { %v83_v21 = vpop.permute.xlu0 %82 }
 0x1e7   :  { %v84_v22 = vsel %vm81_vm7, %v83_v21, 0.0 }
 0x1e8   :  { %v80_v23 = vpop.permute.xlu1 %79  ;;  %v87_v24 = vsel %vm85_vm8, %v78_v18, %v84_v22 }
 0x1e9   :  { %90 = vrot.lane.b32.xlu0 %v87_v24, %s242_s18  ;;  %v86_v25 = vsel %vm85_vm8, %v77_v20, %v80_v23 }
 0x1ea   :  { %88 = vrot.lane.b32.xlu1 %v86_v25, %s242_s18 }
 0x220   :  { %v286_v26 = vpop.xlane.xlu0 %25 }
 0x221   :  { %v28_v27 = vmax.f32 %v286_v26, 1.0  ;;  %v167_v43 = vadd.f32 -1.0, %v286_v26  ;;  %vm27_vm4 = vcmp.gt.f32.partialorder %v286_v26, 1.0 }
 0x223   :  { %182 = vrcp.f32 %v28_v27  ;;  %v30_v44 = vmax.f32 %v167_v43, 1.0 }
 0x225   :  { %184 = vrcp.f32 %v30_v44 }
 0x227   :  { %v33_v28 = vpop.xlane.xlu1 %32 }
 0x22d   :  { %v183_v29 = vpop.eup %182 }
 0x22e   :  { %v35_v30 = vmul.f32 %v183_v29, %v33_v28 }
 0x22f   :  { %v185_v45 = vpop.eup %184 }
 0x230   :  { %v36_v31 = vsub.f32 %v269_v0, %v35_v30  ;;  %v114_v48 = vmax.f32 %v35_v30, 1e-12  ;;  %v121_v57 = vmul.f32 %v169_v51, %v35_v30 }
 0x232   :  { %v37_v32 = vmul.f32 %v166_v2, %v36_v31 }
 0x234   :  { %v38_v33 = vmul.f32 %v37_v32, %v37_v32 }
 0x236   :  { %39 = vadd.xlane.f32.xlu0 %v38_v33 }
 0x25b   :  { %v91_v34 = vpop.permute.xlu0 %90 }
 0x25c   :  { %v92_v35 = vsel %vm54_vm1, %v91_v34, 0.0  ;;  %v89_v36 = vpop.permute.xlu1 %88  ;;  %vm137_vm1 = vcmp.eq.s32.totalorder %v276_v5, 4 }
 0x25d   :  { %v93_v37 = vmul.f32 %v166_v2, %v92_v35  ;;  %v94_v38 = vsub.f32 %v269_v0, %v89_v36  ;;  %v173_v12 = vsel %vm137_vm1, 1.0, %v241_v1 }
 0x25f   :  { %v95_v39 = vmul.f32 %v94_v38, %v93_v37 }
 0x261   :  { %v96_v40 = vmul.f32 %v95_v39, %v95_v39  ;;  %v107_v41 = vand.u32 2147483647, %v95_v39 }
 0x263   :  { %97 = vadd.xlane.f32.xlu1 %v96_v40  ;;  %vm108_vm9 = vcmp.gt.f32.partialorder %v107_v41, 0.05 }
 0x264   :  { %v168_v42 = vsel %vm108_vm9, 1.0, %v241_v1 }
 0x265   :  { %111 = vadd.xlane.f32.xlu0 %v168_v42 }
 0x2c3   :  { %v40_v46 = vpop.xlane.xlu0 %39 }
 0x2c4   :  { %v42_v47 = vmul.f32 %v185_v45, %v40_v46 }
 0x2c6   :  { %186 = vrsqrt.f32 %v42_v47  ;;  %vm45_vm12 = vcmp.eq.f32.partialorder %v42_v47, inf  ;;  %v48_v52 = vand.u32 2147483648, %v42_v47  ;;  %vm47_vm13 = vcmp.eq.f32.partialorder %v42_v47, 0.0 }
 0x2c7   :  { %188 = vrcp.f32 %v114_v48 }
 0x2d0   :  { %v187_v49 = vpop.eup %186 }
 0x2d1   :  { %v44_v50 = vmul.f32 %v187_v49, %v42_v47  ;;  %v189_v55 = vpop.eup %188 }
 0x2d2   :  { %v116_v10 = vmul.f32 60.0, %v189_v55 }
 0x2d3   :  { %v46_v54 = vsel %vm45_vm12, %v42_v47, %v44_v50 }
 0x2d4   :  { %v49_v56 = vsel %vm47_vm13, %v48_v52, %v46_v54  ;;  %v140_v16 = vmul.f32 %v173_v12, %v116_v10 }
 0x2d5   :  { %v125_v58 = vmul.f32 %v170_v53, %v49_v56  ;;  %v117_v59 = vmul.f32 %v189_v55, %v49_v56 }
 0x2d7   :  { %v126_v60 = vadd.f32 %v125_v58, %v121_v57  ;;  %v145_v19 = vmul.f32 %v174_v15, %v117_v59 }
 0x2f0   :  { %v98_v61 = vpop.xlane.xlu1 %97 }
 0x2f1   :  { %v99_v62 = vmul.f32 %v185_v45, %v98_v61 }
 0x2f2   :  { %v112_v0 = vpop.xlane.xlu0 %111 }
 0x2f3   :  { %190 = vrsqrt.f32 %v99_v62  ;;  %vm102_vm0 = vcmp.eq.f32.partialorder %v99_v62, inf  ;;  %v105_v4 = vand.u32 2147483648, %v99_v62  ;;  %vm104_vm2 = vcmp.eq.f32.partialorder %v99_v62, 0.0 }
 0x2f4   :  { %v113_v7 = vmul.f32 %v185_v45, %v112_v0 }
 0x2f6   :  { %v135_v14 = vmul.f32 %v172_v8, %v113_v7 }
 0x2fd   :  { %v191_v63 = vpop.eup %190 }
 0x2fe   :  { %v101_v2 = vmul.f32 %v191_v63, %v99_v62 }
 0x300   :  { %v103_v6 = vsel %vm102_vm0, %v99_v62, %v101_v2 }
 0x301   :  { %v106_v9 = vsel %vm104_vm2, %v105_v4, %v103_v6 }
 0x302   :  { %v130_v11 = vmul.f32 %v171_v3, %v106_v9 }
 0x304   :  { %v131_v13 = vadd.f32 %v130_v11, %v126_v60 }
 0x306   :  { %v136_v17 = vadd.f32 %v135_v14, %v131_v13 }
 0x308   :  { %v141_v18 = vadd.f32 %v140_v16, %v136_v17 }
 0x30a   :  { %v146_v20 = vadd.f32 %v145_v19, %v141_v18 }
 0x30c   :  { %v149_v21 = vsel %vm27_vm4, %v146_v20, 0.0 }
 0x30d   :  { %150 = vst [vmem:[#allocation5] sm:$0xff] %v149_v21 }
 0x30e   :  { %225 = shalt.err (!%p222_p12)
}
 0x30f   :  { %s226_s26 = scalar_lea.hbm %s321_s1, 128 }
 0x310   :  { %p227_p13 = scmp.ne.s32.totalorder %s321_s1, %s226_s26  ;;  %p230_p0 = scmp.lt.u32.totalorder %s226_s26, %s321_s1 }
 0x312   :  { %p232_p1 = pnand %p230_p0, %p227_p13 }
 0x314   :  { %235 = shalt.err (!%p232_p1)
}
 0x315   :  { %160 = dma.vmem_to_hbm [thread:$0]  %s158_s22, 128, %s321_s1, [#allocation4]  }
 0x316   :  { %238 = dma.done.wait [#allocation4], 128  }
 0x317   :  { %239 = vsyncadd [#allocation4], 4294967168 }
 0x318   :  { %164 = vsyncpa [#allocation3], 1 }
 0x319   :  { %165 = vsyncpa [#allocation4], 1 }

</bundles_post_ra>
